<compile_context>
chip_gen: v5e
topology: v5e:2x2
jax: 0.10.0
libtpu: 0.0.40
codegen_flags: <defaults>
</compile_context>

<pallas_src>
import functools
import math

import jax
import jax.numpy as jnp
from jax.experimental import pallas as pl
from jax.experimental.pallas import tpu as pltpu


def _centerpad_kernel(x_ref, o_ref, *, pad_top, pad_left, h, w):
    # Zero-fill the whole output tile once, then overwrite the interior with
    # the input tile via a static-slice store (no lax.pad -> no hidden temp).
    o_ref[...] = jnp.zeros_like(o_ref)
    o_ref[:, pad_top:pad_top + h, pad_left:pad_left + w] = x_ref[...]


def _vmem_capacity_bytes() -> int:
    """Per-TensorCore VMEM capacity; conservative fallback if query fails."""
    try:
        return int(pltpu.get_tpu_info().vmem_capacity_bytes)
    except Exception:
        # Smallest per-TC VMEM across supported generations (v7x: 64 MiB).
        return 64 * 1024 * 1024


def _pick_block(nc: int, per_item_bytes: int, budget_bytes: int):
    """Largest exact divisor of nc whose tiles fit the VMEM budget.

    Preference order: (a) >=2 grid steps with an even step count (balanced
    split across v7x's 2 TensorCores, pipeline overlap everywhere),
    (b) >=2 grid steps, (c) anything that fits.  Returns None if even a
    single item does not fit (caller falls back to XLA pad).
    """
    divisors = [d for d in range(1, nc + 1) if nc % d == 0]
    fits = [d for d in divisors if d * per_item_bytes <= budget_bytes]
    if not fits:
        return None
    preferences = (
        lambda d: (nc // d) >= 2 and (nc // d) % 2 == 0,
        lambda d: (nc // d) >= 2,
        lambda d: True,
    )
    for pred in preferences:
        cands = [d for d in fits if pred(d)]
        if cands:
            return max(cands)
    return None  # unreachable


def center_pad(x: jax.Array, target_dim: int) -> jax.Array:
    """Pallas CenterPad matching the torch module (..., H, W) -> padded."""
    *lead, h, w = x.shape
    assert target_dim >= h and target_dim >= w

    height_pad = target_dim - h
    width_pad = target_dim - w
    left_height_pad = height_pad // 2
    left_width_pad = width_pad // 2

    # Exactly mirroring torch F.pad's last-dim-first convention:
    #   width (last dim)   gets (left_height_pad, height_pad - left_height_pad)
    #   height (2nd-last)  gets (left_width_pad,  width_pad  - left_width_pad)
    pad_left = left_height_pad
    pad_right = height_pad - left_height_pad
    pad_top = left_width_pad
    pad_bot = width_pad - left_width_pad
    h_out = h + pad_top + pad_bot
    w_out = w + pad_left + pad_right

    if pad_left == 0 and pad_right == 0 and pad_top == 0 and pad_bot == 0:
        return x  # nothing to do

    nc = math.prod(lead) if lead else 1
    itemsize = jnp.dtype(x.dtype).itemsize

    # Per-generation VMEM budget: tiles get ~60% of per-TC capacity; the
    # scoped limit is raised to ~85% so Mosaic scratch still has headroom.
    capacity = _vmem_capacity_bytes()
    tile_budget = int(capacity * 0.6)
    vmem_limit = int(capacity * 0.85)

    in_bytes = h * w * itemsize
    out_bytes = h_out * w_out * itemsize
    # 2x: double-buffered input + output pipelines; +in_bytes slack for the
    # interior-copy working set / Mosaic internal scratch.
    per_item_bytes = 2 * (in_bytes + out_bytes) + in_bytes

    blk = _pick_block(nc, per_item_bytes, tile_budget)
    if blk is None:
        # Single item already exceeds the VMEM budget (huge spatial dims).
        # TODO(synk): H-row-tiled Pallas grid instead of the XLA fallback.
        return _reference_center_pad(x, target_dim)

    x_flat = x.reshape(nc, h, w)

    kernel = functools.partial(
        _centerpad_kernel, pad_top=pad_top, pad_left=pad_left, h=h, w=w
    )

    out_flat = pl.pallas_call(
        kernel,
        out_shape=jax.ShapeDtypeStruct((nc, h_out, w_out), x.dtype),
        grid_spec=pltpu.PrefetchScalarGridSpec(
            num_scalar_prefetch=0,
            grid=(nc // blk,),
            in_specs=[pl.BlockSpec((blk, h, w), lambda i: (i, 0, 0))],
            out_specs=pl.BlockSpec((blk, h_out, w_out), lambda i: (i, 0, 0)),
        ),
        compiler_params=pltpu.CompilerParams(
            dimension_semantics=("parallel",),
            vmem_limit_bytes=vmem_limit,
        ),
        cost_estimate=pl.CostEstimate(
            flops=0,
            transcendentals=0,
            bytes_accessed=int(nc * (in_bytes + out_bytes)),
        ),
    )(x_flat)

    return out_flat.reshape(*lead, h_out, w_out)


def _reference_center_pad(x: jax.Array, target_dim: int) -> jax.Array:
    """Pure-JAX reference matching the torch module exactly."""
    *_, h, w = x.shape
    height_pad = target_dim - h
    width_pad = target_dim - w
    lhp = height_pad // 2
    lwp = width_pad // 2
    # torch F.pad (lhp, hp-lhp, lwp, wp-lwp) == pad width by (lhp, hp-lhp),
    # height by (lwp, wp-lwp).
    pad_cfg = [(0, 0)] * (x.ndim - 2) + [
        (lwp, width_pad - lwp),
        (lhp, height_pad - lhp),
    ]
    return jnp.pad(x, pad_cfg, constant_values=0)


if __name__ == "__main__":
    key = jax.random.PRNGKey(0)
    N, C, H, W = 2, 4, 16, 16
    target_dim = 24

    x = jax.random.normal(key, (N, C, H, W), dtype=jnp.float32)

    out = jax.block_until_ready(center_pad(x, target_dim))
    ref = _reference_center_pad(x, target_dim)
    assert out.shape == ref.shape, (out.shape, ref.shape)
    assert out.dtype == ref.dtype
    assert jnp.array_equal(out, ref), "Pallas CenterPad mismatch vs reference"

    # Non-square input: pads swap exactly like torch F.pad's last-dim-first
    # convention (width gets the "height" pads and vice versa).
    x2 = jax.random.normal(key, (1, 4, 12, 16), dtype=jnp.float32)
    out2 = jax.block_until_ready(center_pad(x2, target_dim))
    ref2 = _reference_center_pad(x2, target_dim)
    assert out2.shape == ref2.shape, (out2.shape, ref2.shape)
    assert jnp.array_equal(out2, ref2), "Pallas CenterPad mismatch (non-square)"

    print("KERNEL_OK")
</pallas_src>

<mosaic_0001>
module attributes {stable_mosaic.version = 11 : i64} {
  func.func @_centerpad_kernel(%arg0: i32, %arg1: memref<4x16x16xf32, #tpu.memory_space<vmem>>, %arg2: memref<4x24x24xf32, #tpu.memory_space<vmem>>) attributes {dimension_semantics = [#tpu.dimension_semantics<parallel>], iteration_bounds = array<i64: 2>, scalar_prefetch = 0 : i64, scratch_operands = 0 : i64, tpu.core_type = #tpu.core_type<tc>, window_params = [{transform_indices = @transform_0, window_bounds = array<i64: 4, 16, 16>}, {transform_indices = @transform_1, window_bounds = array<i64: 4, 24, 24>}]} {
    %cst = arith.constant 0.000000e+00 : f32
    %0 = vector.broadcast %cst : f32 to vector<4x24x24xf32>
    %c0 = arith.constant 0 : index
    %c0_0 = arith.constant 0 : index
    %c0_1 = arith.constant 0 : index
    %1 = vector.load %arg2[%c0, %c0_0, %c0_1] : memref<4x24x24xf32, #tpu.memory_space<vmem>>, vector<4x24x24xf32>
    tpu.vector_store %arg2[%c0, %c0_0, %c0_1], %0 {strides = array<i32>} : memref<4x24x24xf32, #tpu.memory_space<vmem>>, vector<4x24x24xf32>,
    %c0_2 = arith.constant 0 : index
    %c0_3 = arith.constant 0 : index
    %c0_4 = arith.constant 0 : index
    %2 = vector.load %arg1[%c0_2, %c0_3, %c0_4] : memref<4x16x16xf32, #tpu.memory_space<vmem>>, vector<4x16x16xf32>
    %c0_5 = arith.constant 0 : index
    %c4 = arith.constant 4 : index
    %c4_6 = arith.constant 4 : index
    %3 = vector.load %arg2[%c0_5, %c4, %c4_6] : memref<4x24x24xf32, #tpu.memory_space<vmem>>, vector<4x16x16xf32>
    tpu.vector_store %arg2[%c0_5, %c4, %c4_6], %2 {strides = array<i32>} : memref<4x24x24xf32, #tpu.memory_space<vmem>>, vector<4x16x16xf32>,
    return
  }
  func.func @transform_0(%arg0: i32) -> (i32, i32, i32) {
    %c0_i32 = arith.constant 0 : i32
    %c0_i32_0 = arith.constant 0 : i32
    %c0_i32_1 = arith.constant 0 : i32
    return %arg0, %c0_i32, %c0_i32_0 : i32, i32, i32
  }
  func.func @transform_1(%arg0: i32) -> (i32, i32, i32) {
    %c0_i32 = arith.constant 0 : i32
    %c0_i32_0 = arith.constant 0 : i32
    %c0_i32_1 = arith.constant 0 : i32
    return %arg0, %c0_i32, %c0_i32_0 : i32, i32, i32
  }
}

</mosaic_0001>

<bundles_post_ra>
// kernel: tpu_custom_call.1
= control target key start
LH: loop header
LB: loop body
LE: loop exit
PB: predicated region body
PF: predicated region fallthrough
CT: control target
= control target key end

     0   :  { %6 = vsyncpa [#allocation3], 0  ;;  %s657_s0 = inlined_call_operand.hbm [shape: f32[8,16,16], index: 0, kind: input, shape index: {}]   ;;  %s658_s1 = inlined_call_operand.hbm [shape: f32[8,24,24], index: 1, kind: output, shape index: {}]  }
   0x1   :  { %8 = vsyncpa [#allocation3 + $0x1], 0 }
   0x2   :  { %9 = vsyncpa [#allocation4], 0 }
   0x3   :  { %11 = vsyncpa [#allocation4 + $0x1], 0  ;;  %s476_s6 = smov 0   ;;  %s478_s7 = smov 0  }
   0x4   :  { %s480_s8 = smov 0   ;;  %s482_s9 = smov 0  }
   0x5 LB: > { %s497_s10 = sadd.s32 4294967295, %s458_s9   ;;  %s292_s11 = sadd.s32 4294967294, %s458_s9   ;;  %s458_s9 = sphi %s482_s9, %s668_s9   ;;  %s454_s8 = sphi %s480_s8, %s667_s8   ;;  %s450_s7 = sphi %s478_s7, %s666_s7   ;;  %s446_s6 = sphi %s476_s6, %s665_s6  }
   0x6   : > { %s501_s12 = sadd.s32 1, %s458_s9   ;;  %s24_s13 = sadd.s32 1, %s454_s8 }
   0x7   : > { %s21_s14 = ssub.s32 %s458_s9, %s501_s12  ;;  %p31_p0 = scmp.ne.s32.totalorder %s454_s8, %s450_s7 }
   0x8   : > { %p22_p1 = scmp.eq.s32.totalorder %s21_s14, 0  ;;  %p32_p2 = scmp.eq.s32.totalorder %s458_s9, 0 }
   0x9   : > { %p37_p3 = scmp.ne.s32.totalorder %s450_s7, %s446_s6  ;;  %p38_p4 = scmp.eq.s32.totalorder %s497_s10, 0 }
   0xa   : > { %s513_s15 = scalar_select %p22_p1, %s454_s8, %s24_s13  }
   0xb   : > { %p515_p5 = por %p32_p2, %p31_p0  ;;  %p519_p6 = por %p38_p4, %p37_p3 }
   0xc   : > { %p61_p7 = scmp.eq.s32.totalorder %s497_s10, 1  ;;  %p67_p8 = scmp.eq.s32.totalorder %s292_s11, 1 }
   0xd   : > { %p322_p10 = scmp.lt.s32.totalorder %s458_s9, 2  ;;  %s87_s20 = sand.u32 1, %s454_s8  }
   0xe   : > { %p526_p11 = por %p61_p7, %p31_p0  ;;  %p530_p12 = por %p67_p8, %p37_p3 }
   0xf   : > { %s307_s21 = sshll.u32 %s458_s9, 6  ;;  %s295_s22 = sshll.u32 %s87_s20, 6 }
  0x10   : > { %s97_s25 = scalar_lea.hbm %s657_s0, %s307_s21  ;;  %s91_s27 = scalar_lea.vmem [#allocation2], %s295_s22 }
  0x11   : > { %s98_s26 = sshll.u32 %s97_s25, 4  ;;  %s100_s28 = sshll.u32 %s91_s27, 4  ;;  %s99_s26 = int_to_ptr.hbm [resolvable:$true] %s98_s26  ;;  %s101_s28 = int_to_ptr.vmem [resolvable:$true] %s100_s28 }
  0x12   : > { %p541_p13 = pnand %p322_p10, %p515_p5  ;;  %p299_p0 = scmp.ge.s32.totalorder %s458_s9, 1 }
  0x13   : > { %p108_p1 = scmp.lt.s32.totalorder %s458_s9, 3  ;;  %s88_s30 = scalar_lea.sflag [#allocation3], %s87_s20 }
  0x14   : > { %s362_s2 = sshra.s32 %s99_s26, 4  ;;  %p366_p3 = pneg %p541_p13  ;;  %s363_s2 = int_to_ptr.hbm [resolvable:$true] %s362_s2 }
  0x15   : > { %s364_s3 = scalar_lea.hbm %s363_s2, 64  ;;  %s369_s11 = scalar_lea.hbm %s657_s0, 128 }
  0x16   : > { %p365_p2 = scmp.ne.s32.totalorder %s363_s2, %s364_s3  ;;  %p370_p5 = scmp.lt.s32.totalorder %s363_s2, %s657_s0 }
  0x17   : > { %p371_p8 = scmp.lt.s32.totalorder %s369_s11, %s364_s3 }
  0x18   : > { %p367_p4 = pnand %p366_p3, %p365_p2 }
  0x19   : > { %p372_p10 = por %p371_p8, %p370_p5 }
  0x1a   : > { %p368_p7 = pneg %p367_p4 }
  0x1c   : > { %p373_p9 = pnand %p372_p10, %p368_p7 }
  0x1e   : > { %376 = shalt.err (!%p373_p9)
}
  0x1f   : > { %s460_s16 = smov 128   ;;  %s461_s20 = smov 8  }
  0x20   : > { %317 = dma.hbm_to_vmem [thread:$0]  (!%p541_p13), %s99_s26, 1024, %s101_s28, %s88_s30, %s460_s16, %s460_s16, %s461_s20  }
  0x21   : > { %p109_p2 = pnand %p299_p0, %p108_p1 }
  0x22   : > { %s562_s21 = sand.u32 (!%p109_p2), 1, %s450_s7  }
  0x23   : > { %112 = sbr.rel (%p109_p2) target bundleno = 179 (0xb3), region = 24  ;;  %s300_s22 = sshll.u32 (!%p109_p2), %s562_s21, 6 }
  0x24   : > { %s115_s23 = scalar_lea.sflag (!%p109_p2), [#allocation3], %s562_s21  ;;  %s566_s24 = scalar_lea.vmem (!%p109_p2), [#allocation2], %s300_s22 }
  0x28   : > { %437 = dma.done.wait (%p519_p6), %s115_s23, 1024  }
  0x29   : > { %439 = vsyncadd (%p519_p6), %s115_s23, 4294966272  ;;  %s308_s25 = smul.u32 96, %s562_s21  ;;  %vm140_vm0 = vcmask 195584   ;;  %v462_v0 = vmov 0.0   ;;  %v155_v1 = vld [vmem:[%s566_s24 + $0x10] sm:$0xff]  ;;  %v153_v2 = vld [vmem:[%s566_s24] sm:$0xff] }
  0x2a   : > { %s463_s17 = smov 4   ;;  %v157_v3 = vld [vmem:[%s566_s24 + $0x20] sm:$0xff]  ;;  %v156_v4 = vld [vmem:[%s566_s24 + $0x18] sm:$0xff]  ;;  %v154_v5 = vld [vmem:[%s566_s24 + $0x8] sm:$0xff]  ;;  %vm193_vm1 = vcmask 162848   ;;  %s309_s27 = smul.u32 96, %s497_s10 }
  0x2b   : > { %s573_s26 = scalar_lea.vmem [#allocation5], %s308_s25  ;;  %173 = vrot.lane.b32.xlu1 %v155_v1, %s463_s17  ;;  %169 = vrot.lane.b32.xlu0 %v153_v2, %s463_s17  ;;  %v158_v6 = vld [vmem:[%s566_s24 + $0x28] sm:$0xff]  ;;  %v160_v7 = vld [vmem:[%s566_s24 + $0x38] sm:$0xff]  ;;  %s203_s10 = scalar_lea.sflag [#allocation4], %s562_s21 }
  0x2c   : > { %144 = vst.msk [vmem:[%s573_s26 + $0x18] sm:$0xff] %vm140_vm0, %v462_v0  ;;  %177 = vrot.lane.b32.xlu2 %v157_v3, %s463_s17  ;;  %v159_v8 = vld [vmem:[%s566_s24 + $0x30] sm:$0xff]  ;;  %s215_s30 = scalar_lea.hbm %s658_s1, %s309_s27  ;;  %s216_s2 = sshll.u32 %s573_s26, 4  ;;  %s217_s2 = int_to_ptr.vmem [resolvable:$true] %s216_s2 }
  0x2d   : > { %145 = vst.msk [vmem:[%s573_s26 + $0x20] sm:$0xff] %vm140_vm0, %v462_v0  ;;  %s218_s3 = sshll.u32 %s215_s30, 4  ;;  %s412_s14 = scalar_lea.hbm %s658_s1, 192  ;;  %s219_s3 = int_to_ptr.hbm [resolvable:$true] %s218_s3 }
  0x2e   : > { %141 = vst.msk [vmem:[%s573_s26] sm:$0xff] %vm140_vm0, %v462_v0  ;;  %s406_s4 = sshra.s32 %s219_s3, 4  ;;  %s407_s4 = int_to_ptr.hbm [resolvable:$true] %s406_s4 }
  0x2f   : > { %142 = vst.msk [vmem:[%s573_s26 + $0x8] sm:$0xff] %vm140_vm0, %v462_v0  ;;  %s408_s5 = scalar_lea.hbm %s407_s4, 96  ;;  %p413_p0 = scmp.lt.s32.totalorder %s407_s4, %s658_s1 }
  0x30   : > { %143 = vst.msk [vmem:[%s573_s26 + $0x10] sm:$0xff] %vm140_vm0, %v462_v0  ;;  %p409_p6 = scmp.ne.s32.totalorder %s407_s4, %s408_s5  ;;  %p414_p1 = scmp.lt.s32.totalorder %s412_s14, %s408_s5 }
  0x31   : > { %146 = vst.msk [vmem:[%s573_s26 + $0x28] sm:$0xff] %vm140_vm0, %v462_v0 }
  0x32   : > { %147 = vst.msk [vmem:[%s573_s26 + $0x30] sm:$0xff] %vm140_vm0, %v462_v0  ;;  %p410_p9 = pnand %p409_p6, %p526_p11  ;;  %p415_p3 = por %p414_p1, %p413_p0 }
  0x33   : > { %148 = vst.msk [vmem:[%s573_s26 + $0x38] sm:$0xff] %vm140_vm0, %v462_v0  ;;  %175 = vrot.lane.b32.xlu1 %v156_v4, %s463_s17  ;;  %171 = vrot.lane.b32.xlu0 %v154_v5, %s463_s17 }
  0x34   : > { %149 = vst.msk [vmem:[%s573_s26 + $0x40] sm:$0xff] %vm140_vm0, %v462_v0  ;;  %179 = vrot.lane.b32.xlu2 %v158_v6, %s463_s17  ;;  %p411_p13 = pneg %p410_p9 }
  0x35   : > { %150 = vst.msk [vmem:[%s573_s26 + $0x48] sm:$0xff] %vm140_vm0, %v462_v0 }
  0x36   : > { %151 = vst.msk [vmem:[%s573_s26 + $0x50] sm:$0xff] %vm140_vm0, %v462_v0  ;;  %p416_p4 = pnand %p415_p3, %p411_p13 }
  0x37   : > { %152 = vst.msk [vmem:[%s573_s26 + $0x58] sm:$0xff] %vm140_vm0, %v462_v0 }
  0x3b   : > { %183 = vrot.lane.b32.xlu1 %v160_v7, %s463_s17  ;;  %181 = vrot.lane.b32.xlu0 %v159_v8, %s463_s17 }
  0x86   : > { %v178_v9 = vpop.permute.xlu2 %177 }
  0x87   : > { %198 = vst.msk [vmem:[%s573_s26 + $0x34] sm:$0xff] %vm193_vm1, %v178_v9 }
  0x8e   : > { %v180_v10 = vpop.permute.xlu2 %179 }
  0x8f   : > { %199 = vst.msk [vmem:[%s573_s26 + $0x3c] sm:$0xff] %vm193_vm1, %v180_v10 }
  0x9d   : > { %v174_v11 = vpop.permute.xlu1 %173  ;;  %v170_v12 = vpop.permute.xlu0 %169 }
  0x9e   : > { %196 = vst.msk [vmem:[%s573_s26 + $0x1c] sm:$0xff] %vm193_vm1, %v174_v11 }
  0x9f   : > { %194 = vst.msk [vmem:[%s573_s26 + $0x4] sm:$0xff] %vm193_vm1, %v170_v12 }
  0xa5   : > { %v176_v13 = vpop.permute.xlu1 %175  ;;  %v172_v14 = vpop.permute.xlu0 %171 }
  0xa6   : > { %197 = vst.msk [vmem:[%s573_s26 + $0x24] sm:$0xff] %vm193_vm1, %v176_v13 }
  0xa7   : > { %195 = vst.msk [vmem:[%s573_s26 + $0xc] sm:$0xff] %vm193_vm1, %v172_v14 }
  0xad   : > { %v184_v15 = vpop.permute.xlu1 %183  ;;  %v182_v16 = vpop.permute.xlu0 %181 }
  0xae   : > { %201 = vst.msk [vmem:[%s573_s26 + $0x54] sm:$0xff] %vm193_vm1, %v184_v15 }
  0xaf   : > { %200 = vst.msk [vmem:[%s573_s26 + $0x4c] sm:$0xff] %vm193_vm1, %v182_v16 }
  0xb0   : > { %419 = shalt.err (!%p416_p4)
}
  0xb1   : > { %s464_s21 = smov 128   ;;  %s465_s22 = smov 8  }
  0xb2   : > { %312 = dma.vmem_to_hbm [thread:$0]  (%p526_p11), %s217_s2, 1536, %s219_s3, %s203_s10, %s464_s21, %s464_s21, %s465_s22  }
  0xb3 PF: > { %s233_s23 = sand.u32 1, %s446_s6   ;;  %p664_p7 = scmp.ge.s32.totalorder %s458_s9, 2 }
  0xb4   : > { %s234_s24 = scalar_lea.sflag [#allocation4], %s233_s23 }
  0xb5   : > { %p319_p5 = pnand %p664_p7, %p530_p12 }
  0xb7   : > { %p320_p8 = pneg %p319_p5 }
  0xb9   : > { %441 = dma.done.wait (%p320_p8), %s234_s24, 1536  }
  0xba   : > { %443 = vsyncadd (%p320_p8), %s234_s24, 4294965760  ;;  %p14_p10 = scmp.ge.s32.totalorder %s501_s12, 4   ;;  %s665_s6 = smov %s450_s7 }
  0xbb   : > { %s666_s7 = smov %s454_s8  ;;  %s667_s8 = smov %s513_s15 }
  0xbc   : > { %s668_s9 = smov %s501_s12  ;;  %16 = sbr.rel (!%p14_p10) target bundleno = 5 (0x5), region = 69 }
  0xc1   :  { %240 = vsyncpa [#allocation3], 1 }
  0xc2   :  { %242 = vsyncpa [#allocation3 + $0x1], 1 }
  0xc3   :  { %243 = vsyncpa [#allocation4], 1 }
  0xc4   :  { %245 = vsyncpa [#allocation4 + $0x1], 1 }

</bundles_post_ra>
